<compile_context>
chip_gen: v7x
topology: tpu7x:2x2x1
jax: 0.10.0
libtpu: 0.0.40
codegen_flags: <defaults>
</compile_context>

<pallas_src>
import functools

import jax
import jax.numpy as jnp
from jax.experimental import pallas as pl
from jax.experimental.pallas import tpu as pltpu


# ----------------------------------------------------------------------------
# helpers
# ----------------------------------------------------------------------------
def _ru(x, m):
    return (x + m - 1) // m * m


def _pad2d(a, rows, cols):
    r, c = a.shape
    return jnp.pad(a, ((0, rows - r), (0, cols - c)))


def _choose_tm(m):
    """Row-tile: 256 for big M (feeds 2x256 MXU, >=2 parallel blocks for the
    2 TensorCores on v7x), 128 for medium M, single block for tiny M."""
    if m >= 512:
        return 256
    if m >= 256:
        return 128
    return _ru(max(m, 8), 8)


# ----------------------------------------------------------------------------
# Pallas kernel 1: matmul + per-column scale/bias + activation
#   (every conv layer; BatchNorm folded into scale/bias)
# ----------------------------------------------------------------------------
def _mm_fused_kernel(a_ref, w_ref, s_ref, b_ref, o_ref, *, act):
    # single-K variant: whole contraction in one dot, epilogue fused.
    y = jnp.dot(a_ref[...], w_ref[...], preferred_element_type=jnp.float32)
    y = y * s_ref[...] + b_ref[...]
    if act == "leaky":
        y = jnp.where(y > 0.0, y, 0.2 * y)
    elif act == "relu":
        y = jnp.maximum(y, 0.0)
    o_ref[...] = y.astype(o_ref.dtype)


def _mm_acc_kernel(a_ref, w_ref, s_ref, b_ref, o_ref, acc_ref, *, act):
    # K-loop variant (only for the K=4096/8192 discriminator layers).
    k = pl.program_id(1)

    @pl.when(k == 0)
    def _():
        acc_ref[...] = jnp.zeros_like(acc_ref)

    acc_ref[...] += jnp.dot(a_ref[...], w_ref[...],
                            preferred_element_type=jnp.float32)

    @pl.when(k == pl.num_programs(1) - 1)
    def _():
        y = acc_ref[...] * s_ref[...] + b_ref[...]
        if act == "leaky":
            y = jnp.where(y > 0.0, y, 0.2 * y)
        elif act == "relu":
            y = jnp.maximum(y, 0.0)
        o_ref[...] = y.astype(o_ref.dtype)


_K_SINGLE_MAX = 2048   # keep a K loop above this (v7x VMEM budget)
_TK_LOOP = 512


def matmul_scale_bias_act(a, w, scale, bias, act, out_dtype=jnp.float32):
    """a:(M,K) @ w:(K,N) -> (M,N), then *scale + bias (per col), then act.
    MXU runs in bf16, accumulation + epilogue in f32."""
    M, K = a.shape
    _, N = w.shape

    TM = _choose_tm(M)
    Mp = _ru(M, TM)
    Np = _ru(N, 128)

    s_p = _pad2d(scale.reshape(1, -1).astype(jnp.float32), 1, Np)
    b_p = _pad2d(bias.reshape(1, -1).astype(jnp.float32), 1, Np)

    if K <= _K_SINGLE_MAX:
        Kp = _ru(K, 128)
        a_p = _pad2d(a.astype(jnp.bfloat16), Mp, Kp)
        w_p = _pad2d(w.astype(jnp.bfloat16), Kp, Np)
        out = pl.pallas_call(
            functools.partial(_mm_fused_kernel, act=act),
            out_shape=jax.ShapeDtypeStruct((Mp, Np), out_dtype),
            grid_spec=pltpu.PrefetchScalarGridSpec(
                num_scalar_prefetch=0,
                grid=(Mp // TM,),
                in_specs=[
                    pl.BlockSpec((TM, Kp), lambda i: (i, 0)),
                    pl.BlockSpec((Kp, Np), lambda i: (0, 0)),  # weight DMA'd once
                    pl.BlockSpec((1, Np), lambda i: (0, 0)),
                    pl.BlockSpec((1, Np), lambda i: (0, 0)),
                ],
                out_specs=pl.BlockSpec((TM, Np), lambda i: (i, 0)),
            ),
            compiler_params=pltpu.CompilerParams(
                dimension_semantics=("parallel",)),
        )(a_p, w_p, s_p, b_p)
    else:
        TK = _TK_LOOP
        Kp = _ru(K, TK)
        a_p = _pad2d(a.astype(jnp.bfloat16), Mp, Kp)
        w_p = _pad2d(w.astype(jnp.bfloat16), Kp, Np)
        out = pl.pallas_call(
            functools.partial(_mm_acc_kernel, act=act),
            out_shape=jax.ShapeDtypeStruct((Mp, Np), out_dtype),
            grid_spec=pltpu.PrefetchScalarGridSpec(
                num_scalar_prefetch=0,
                grid=(Mp // TM, Kp // TK),
                in_specs=[
                    pl.BlockSpec((TM, TK), lambda i, k: (i, k)),
                    pl.BlockSpec((TK, Np), lambda i, k: (k, 0)),
                    pl.BlockSpec((1, Np), lambda i, k: (0, 0)),
                    pl.BlockSpec((1, Np), lambda i, k: (0, 0)),
                ],
                out_specs=pl.BlockSpec((TM, Np), lambda i, k: (i, 0)),
                scratch_shapes=[pltpu.VMEM((TM, Np), jnp.float32)],
            ),
            compiler_params=pltpu.CompilerParams(
                dimension_semantics=("parallel", "arbitrary")),
        )(a_p, w_p, s_p, b_p)
    return out[:M, :N]


# ----------------------------------------------------------------------------
# Pallas kernel 2: tiled sum(|x - y|)  (L1 reconstruction loss)
#   Large (<=512,128) blocks, (8,128) vector accumulator, cross-lane reduce
#   deferred to the final step.  Zero-padding contributes 0 -> no mask needed.
# ----------------------------------------------------------------------------
def _abs_sum_kernel(x_ref, y_ref, o_ref, acc_ref):
    i = pl.program_id(0)

    @pl.when(i == 0)
    def _():
        acc_ref[...] = jnp.zeros_like(acc_ref)

    d = jnp.abs(x_ref[...] - y_ref[...])
    tr = d.shape[0]
    acc_ref[...] += jnp.sum(d.reshape(tr // 8, 8, 128), axis=0)

    @pl.when(i == pl.num_programs(0) - 1)
    def _():
        o_ref[...] = jnp.sum(acc_ref[...], keepdims=True)


def l1_sum_pallas(x, y):
    xf = x.reshape(-1).astype(jnp.float32)
    yf = y.reshape(-1).astype(jnp.float32)
    n = xf.shape[0]
    cols = 128
    rows = _ru(pl.cdiv(n, cols), 8)
    tr = min(512, rows)
    rows = _ru(rows, tr)
    pad = rows * cols - n
    x2 = jnp.pad(xf, (0, pad)).reshape(rows, cols)
    y2 = jnp.pad(yf, (0, pad)).reshape(rows, cols)

    out = pl.pallas_call(
        _abs_sum_kernel,
        out_shape=jax.ShapeDtypeStruct((1, 1), jnp.float32),
        grid_spec=pltpu.PrefetchScalarGridSpec(
            num_scalar_prefetch=0,
            grid=(rows // tr,),
            in_specs=[
                pl.BlockSpec((tr, cols), lambda i: (i, 0)),
                pl.BlockSpec((tr, cols), lambda i: (i, 0)),
            ],
            out_specs=pl.BlockSpec((1, 1), lambda i: (0, 0)),
            scratch_shapes=[pltpu.VMEM((8, 128), jnp.float32)],
        ),
        compiler_params=pltpu.CompilerParams(
            dimension_semantics=("arbitrary",)),
    )(x2, y2)
    return out[0, 0]


# ----------------------------------------------------------------------------
# Pallas kernel 3a: plain sum (generator g_loss: zero padding is harmless)
# ----------------------------------------------------------------------------
def _sum_kernel(x_ref, o_ref):
    o_ref[...] = jnp.sum(x_ref[...], keepdims=True)


def sum_pallas(x):
    xf = x.reshape(-1).astype(jnp.float32)
    n = xf.shape[0]
    cols = 128
    rows = _ru(pl.cdiv(n, cols), 8)
    pad = rows * cols - n
    x2 = jnp.pad(xf, (0, pad)).reshape(rows, cols)
    out = pl.pallas_call(
        _sum_kernel,
        out_shape=jax.ShapeDtypeStruct((1, 1), jnp.float32),
        grid_spec=pltpu.PrefetchScalarGridSpec(
            num_scalar_prefetch=0,
            grid=(1,),
            in_specs=[pl.BlockSpec((rows, cols), lambda i: (0, 0))],
            out_specs=pl.BlockSpec((1, 1), lambda i: (0, 0)),
        ),
    )(x2)
    return out[0, 0], float(n)


# ----------------------------------------------------------------------------
# Pallas kernel 3b: hinge GAN sums (mask built in-kernel via iota, no mask DMA)
# ----------------------------------------------------------------------------
def _hinge_kernel(r_ref, f_ref, hr_ref, hf_ref, *, n):
    rows, cols = r_ref.shape
    ridx = jax.lax.broadcasted_iota(jnp.int32, (rows, cols), 0)
    cidx = jax.lax.broadcasted_iota(jnp.int32, (rows, cols), 1)
    valid = (ridx * cols + cidx) < n
    r = r_ref[...]
    f = f_ref[...]
    hr_ref[...] = jnp.sum(jnp.where(valid, jnp.maximum(1.0 - r, 0.0), 0.0),
                          keepdims=True)
    hf_ref[...] = jnp.sum(jnp.where(valid, jnp.maximum(1.0 + f, 0.0), 0.0),
                          keepdims=True)


def hinge_sums_pallas(logits_real, logits_fake):
    rf = logits_real.reshape(-1).astype(jnp.float32)
    ff = logits_fake.reshape(-1).astype(jnp.float32)
    n = rf.shape[0]
    cols = 128
    rows = _ru(pl.cdiv(n, cols), 8)
    pad = rows * cols - n
    r2 = jnp.pad(rf, (0, pad)).reshape(rows, cols)
    f2 = jnp.pad(ff, (0, pad)).reshape(rows, cols)

    hr, hf = pl.pallas_call(
        functools.partial(_hinge_kernel, n=n),
        out_shape=(jax.ShapeDtypeStruct((1, 1), jnp.float32),
                   jax.ShapeDtypeStruct((1, 1), jnp.float32)),
        grid_spec=pltpu.PrefetchScalarGridSpec(
            num_scalar_prefetch=0,
            grid=(1,),
            in_specs=[pl.BlockSpec((rows, cols), lambda i: (0, 0))] * 2,
            out_specs=(pl.BlockSpec((1, 1), lambda i: (0, 0)),) * 2,
        ),
    )(r2, f2)
    return hr[0, 0], hf[0, 0], float(n)


# ----------------------------------------------------------------------------
# Pallas kernel 4: LPIPS per-layer feature comparison
#   rows = (image, y, x) flattened, channels on lanes.  Per-row unit-normalize
#   x and x_hat features (approx-reciprocal on the EUP), squared diff, dot
#   with nonnegative lin weights, accumulate into an (8,128) scratch, reduce
#   to a single scalar at the last grid step.  Zero padding (rows & channels)
#   contributes exactly 0 -> no mask.
# ----------------------------------------------------------------------------
def _lpips_diff_kernel(x_ref, y_ref, lw_ref, o_ref, acc_ref):
    i = pl.program_id(0)

    @pl.when(i == 0)
    def _():
        acc_ref[...] = jnp.zeros_like(acc_ref)

    hx = x_ref[...]
    hy = y_ref[...]
    inv_x = pl.reciprocal(
        jnp.sqrt(jnp.sum(hx * hx, axis=-1, keepdims=True)) + 1e-10,
        approx=True)
    inv_y = pl.reciprocal(
        jnp.sqrt(jnp.sum(hy * hy, axis=-1, keepdims=True)) + 1e-10,
        approx=True)
    d = (hx * inv_x - hy * inv_y)
    w = d * d * lw_ref[...]                      # (TR, 128)
    tr = w.shape[0]
    acc_ref[...] += jnp.sum(w.reshape(tr // 8, 8, 128), axis=0)

    @pl.when(i == pl.num_programs(0) - 1)
    def _():
        o_ref[...] = jnp.sum(acc_ref[...], keepdims=True)


def lpips_layer_diff_sum(hx, hy, lin_w):
    """sum over all rows of sum_c lin_w[c] * (norm(hx) - norm(hy))^2."""
    m, c = hx.shape
    cp = 128                                       # C <= 64 in this extractor
    rows = _ru(max(m, 8), 8)
    tr = min(512, rows)
    rows = _ru(rows, tr)
    x2 = _pad2d(hx.astype(jnp.float32), rows, cp)
    y2 = _pad2d(hy.astype(jnp.float32), rows, cp)
    lw = _pad2d(lin_w.reshape(1, -1).astype(jnp.float32), 1, cp)

    out = pl.pallas_call(
        _lpips_diff_kernel,
        out_shape=jax.ShapeDtypeStruct((1, 1), jnp.float32),
        grid_spec=pltpu.PrefetchScalarGridSpec(
            num_scalar_prefetch=0,
            grid=(rows // tr,),
            in_specs=[
                pl.BlockSpec((tr, cp), lambda i: (i, 0)),
                pl.BlockSpec((tr, cp), lambda i: (i, 0)),
                pl.BlockSpec((1, cp), lambda i: (0, 0)),
            ],
            out_specs=pl.BlockSpec((1, 1), lambda i: (0, 0)),
            scratch_shapes=[pltpu.VMEM((8, 128), jnp.float32)],
        ),
        compiler_params=pltpu.CompilerParams(
            dimension_semantics=("arbitrary",)),
    )(x2, y2, lw)
    return out[0, 0]


# ----------------------------------------------------------------------------
# conv2d in NHWC: tap-sliced patch matrix (channels-last, no transposes)
#                 + Pallas matmul kernel
# ----------------------------------------------------------------------------
def conv2d_nhwc(x_nhwc, w_oihw, scale, bias, stride, pad, act,
                out_dtype=jnp.bfloat16):
    n, h, w, cin = x_nhwc.shape
    cout, _, kh, kw = w_oihw.shape
    xp = jnp.pad(x_nhwc, ((0, 0), (pad, pad), (pad, pad), (0, 0)))
    hp, wp = h + 2 * pad, w + 2 * pad
    oh = (hp - kh) // stride + 1
    ow = (wp - kw) // stride + 1

    taps = []
    for i in range(kh):
        for j in range(kw):
            taps.append(xp[:, i:i + stride * oh:stride,
                           j:j + stride * ow:stride, :])
    # feature ordering: (tap_i, tap_j, cin) -- concatenated along lanes
    patches = jnp.concatenate(taps, axis=-1).reshape(n * oh * ow, kh * kw * cin)

    # weight reorder to match: (kh, kw, cin, cout) -> (kh*kw*cin, cout)
    wmat = jnp.transpose(w_oihw, (2, 3, 1, 0)).reshape(kh * kw * cin, cout)

    out2d = matmul_scale_bias_act(patches, wmat, scale, bias, act, out_dtype)
    return out2d.reshape(n, oh, ow, cout)          # stays channels-last


# ----------------------------------------------------------------------------
# PatchGAN discriminator (n_layers=3, ndf=64, in=3), BN folded to scale/bias
# ----------------------------------------------------------------------------
def discriminator_forward(x_nhwc, p):
    h = conv2d_nhwc(x_nhwc, p["w1"], jnp.ones((64,)), p["b1"], 2, 1, "leaky")
    h = conv2d_nhwc(h, p["w2"], p["g2"], p["be2"], 2, 1, "leaky")
    h = conv2d_nhwc(h, p["w3"], p["g3"], p["be3"], 2, 1, "leaky")
    h = conv2d_nhwc(h, p["w4"], p["g4"], p["be4"], 1, 1, "leaky")
    h = conv2d_nhwc(h, p["w5"], jnp.ones((1,)), p["b5"], 1, 1, "none",
                    out_dtype=jnp.float32)
    return h  # (N, oh, ow, 1)


# ----------------------------------------------------------------------------
# mini-LPIPS: x and x_hat are run through ONE batched conv chain per layer.
# Only mean_over_batch(p_loss) enters the loss, so each layer's comparison
# reduces straight to a scalar in the Pallas diff kernel.
# ----------------------------------------------------------------------------
def mini_lpips_mean(x_nhwc, y_nhwc, p):
    shift = jnp.array([-0.030, -0.088, -0.188], jnp.float32).reshape(1, 1, 1, 3)
    scale = jnp.array([0.458, 0.448, 0.450], jnp.float32).reshape(1, 1, 1, 3)
    n = x_nhwc.shape[0]
    h = jnp.concatenate([(x_nhwc - shift) / scale,
                         (y_nhwc - shift) / scale], axis=0)   # batch 2N

    total = jnp.asarray(0.0, jnp.float32)
    for (wc, bc), lin_w in zip(p["convs"], p["lins"]):
        cout = wc.shape[0]
        h = conv2d_nhwc(h, wc, jnp.ones((cout,)), bc, 2, 1, "relu")
        _, oh, ow, c = h.shape
        hx = h[:n].reshape(n * oh * ow, c)
        hy = h[n:].reshape(n * oh * ow, c)
        s = lpips_layer_diff_sum(hx, hy, lin_w)
        total = total + s / float(n * oh * ow)
    return total  # scalar == mean over batch of per-image LPIPS


# ----------------------------------------------------------------------------
# loss helpers (match PyTorch reference semantics)
# ----------------------------------------------------------------------------
def adopt_weight(weight, global_step, threshold=0, value=0.0):
    # trace-safe version of the Python `if global_step < threshold`
    return jnp.where(jnp.asarray(global_step) < threshold, value, weight)


# ----------------------------------------------------------------------------
# VQLPIPSWithDiscriminator.forward
# ----------------------------------------------------------------------------
def vqlpips_forward(codebook_loss, inputs, reconstructions, optimizer_idx,
                    global_step, params, *, disc_start=5000,
                    codebook_weight=1.0, perceptual_weight=1.0,
                    disc_factor=1.0, disc_weight=1.0):
    # one-time NCHW -> NHWC (channels-last for all conv layers)
    x_nhwc = jnp.transpose(inputs, (0, 2, 3, 1)).astype(jnp.float32)
    r_nhwc = jnp.transpose(reconstructions, (0, 2, 3, 1)).astype(jnp.float32)

    df = adopt_weight(disc_factor, global_step, threshold=disc_start)

    if optimizer_idx == 0:
        n_elem = float(inputs.size)
        rec_sum = l1_sum_pallas(inputs, reconstructions)          # Pallas reduce
        rec_mean = rec_sum / n_elem

        # mean(rec_loss + pw * p_loss broadcast) == mean(|x-x̂|) + pw*mean(p_loss)
        p_mean = mini_lpips_mean(x_nhwc, r_nhwc, params["lpips"])
        nll_loss = rec_mean + perceptual_weight * p_mean

        logits_fake = discriminator_forward(r_nhwc, params["disc"])
        s_fake, cnt = sum_pallas(logits_fake)
        g_loss = -(s_fake / cnt)
        # TODO(synk): adaptive d_weight needs grads of nll/g_loss w.r.t. the
        # decoder last layer through the Pallas kernels; eval-mode fallback
        # (the RuntimeError branch of the reference) uses 0.0.
        d_weight = jnp.asarray(0.0, jnp.float32)
        loss = (nll_loss + d_weight * df * g_loss
                + codebook_weight * jnp.mean(codebook_loss))
        loss_def = {"aeloss": loss, "rec_loss": nll_loss, "g_loss": g_loss}
        loss_def["combined"] = loss_def["aeloss"] + loss_def["rec_loss"]
        return loss, loss_def

    if optimizer_idx == 1:
        n = inputs.shape[0]
        both = jnp.concatenate([x_nhwc, r_nhwc], axis=0)
        logits = discriminator_forward(both, params["disc"])      # one pass
        logits_real, logits_fake = logits[:n], logits[n:]
        hr, hf, cnt = hinge_sums_pallas(logits_real, logits_fake)
        d_loss_hinge = 0.5 * (hr / cnt + hf / cnt)
        return df * d_loss_hinge


# ----------------------------------------------------------------------------
# deterministic parameter init (mimics weights_init: conv~N(0,0.02), BN~N(1,0.02))
# ----------------------------------------------------------------------------
def init_params(key):
    ks = jax.random.split(key, 16)

    def cw(k, co, ci, kh, kw):
        return 0.02 * jax.random.normal(k, (co, ci, kh, kw), jnp.float32)

    disc = {
        "w1": cw(ks[0], 64, 3, 4, 4),   "b1": jnp.zeros((64,), jnp.float32),
        "w2": cw(ks[1], 128, 64, 4, 4),
        "g2": 1.0 + 0.02 * jax.random.normal(ks[2], (128,), jnp.float32),
        "be2": jnp.zeros((128,), jnp.float32),
        "w3": cw(ks[3], 256, 128, 4, 4),
        "g3": 1.0 + 0.02 * jax.random.normal(ks[4], (256,), jnp.float32),
        "be3": jnp.zeros((256,), jnp.float32),
        "w4": cw(ks[5], 512, 256, 4, 4),
        "g4": 1.0 + 0.02 * jax.random.normal(ks[6], (512,), jnp.float32),
        "be4": jnp.zeros((512,), jnp.float32),
        "w5": cw(ks[7], 1, 512, 4, 4),  "b5": jnp.zeros((1,), jnp.float32),
    }
    lpips = {
        "convs": [
            (0.2 * jax.random.normal(ks[8], (16, 3, 3, 3), jnp.float32),
             jnp.zeros((16,), jnp.float32)),
            (0.1 * jax.random.normal(ks[9], (32, 16, 3, 3), jnp.float32),
             jnp.zeros((32,), jnp.float32)),
            (0.1 * jax.random.normal(ks[10], (64, 32, 3, 3), jnp.float32),
             jnp.zeros((64,), jnp.float32)),
        ],
        "lins": [
            jnp.abs(0.1 * jax.random.normal(ks[11], (16,), jnp.float32)),
            jnp.abs(0.1 * jax.random.normal(ks[12], (32,), jnp.float32)),
            jnp.abs(0.1 * jax.random.normal(ks[13], (64,), jnp.float32)),
        ],
    }
    return {"disc": disc, "lpips": lpips}


# ----------------------------------------------------------------------------
if __name__ == "__main__":
    key = jax.random.PRNGKey(0)
    k1, k2, k3, kp = jax.random.split(key, 4)

    N, C, H, W = 2, 3, 32, 32
    inputs = jax.random.normal(k1, (N, C, H, W), jnp.float32)
    reconstructions = inputs + 0.1 * jax.random.normal(k2, (N, C, H, W),
                                                       jnp.float32)
    codebook_loss = jax.random.uniform(k3, (N,), jnp.float32)
    params = init_params(kp)

    # generator (optimizer_idx=0) branch
    loss, loss_def = vqlpips_forward(codebook_loss, inputs, reconstructions,
                                     optimizer_idx=0, global_step=10000,
                                     params=params)
    # discriminator (optimizer_idx=1) branch
    d_loss = vqlpips_forward(codebook_loss, inputs, reconstructions,
                             optimizer_idx=1, global_step=10000, params=params)

    jax.block_until_ready((loss, loss_def, d_loss))
    print("KERNEL_OK")
</pallas_src>

<mosaic_0001>
module attributes {stable_mosaic.version = 11 : i64} {
  func.func @_abs_sum_kernel(%arg0: i32, %arg1: memref<48x128xf32, #tpu.memory_space<vmem>>, %arg2: memref<48x128xf32, #tpu.memory_space<vmem>>, %arg3: memref<1x1xf32, #tpu.memory_space<vmem>>, %arg4: memref<8x128xf32, #tpu.memory_space<vmem>>) attributes {dimension_semantics = [#tpu.dimension_semantics<arbitrary>], iteration_bounds = array<i64: 1>, scalar_prefetch = 0 : i64, scratch_operands = 1 : i64, tpu.core_type = #tpu.core_type<tc>, window_params = [{transform_indices = @transform_0, window_bounds = array<i64: 48, 128>}, {transform_indices = @transform_1, window_bounds = array<i64: 48, 128>}, {pipeline_mode = #tpu.pipeline_mode<synchronous>, transform_indices = @transform_2, window_bounds = array<i64: 1, 1>}]} {
    %c0_i32 = arith.constant 0 : i32
    %0 = arith.cmpi eq, %arg0, %c0_i32 : i32
    %1 = arith.extui %0 : i1 to i32
    %c0_i32_0 = arith.constant 0 : i32
    %2 = arith.cmpi ne, %1, %c0_i32_0 : i32
    scf.if %2 {
      %cst_10 = arith.constant 0.000000e+00 : f32
      %15 = vector.broadcast %cst_10 : f32 to vector<8x128xf32>
      %c0_11 = arith.constant 0 : index
      %c0_12 = arith.constant 0 : index
      %16 = vector.load %arg4[%c0_11, %c0_12] : memref<8x128xf32, #tpu.memory_space<vmem>>, vector<8x128xf32>
      tpu.vector_store %arg4[%c0_11, %c0_12], %15 {strides = array<i32>} : memref<8x128xf32, #tpu.memory_space<vmem>>, vector<8x128xf32>,
    } else {
    }
    %c0 = arith.constant 0 : index
    %c0_1 = arith.constant 0 : index
    %3 = vector.load %arg1[%c0, %c0_1] : memref<48x128xf32, #tpu.memory_space<vmem>>, vector<48x128xf32>
    %c0_2 = arith.constant 0 : index
    %c0_3 = arith.constant 0 : index
    %4 = vector.load %arg2[%c0_2, %c0_3] : memref<48x128xf32, #tpu.memory_space<vmem>>, vector<48x128xf32>
    %5 = arith.subf %3, %4 : vector<48x128xf32>
    %6 = math.absf %5 : vector<48x128xf32>
    %c0_4 = arith.constant 0 : index
    %c0_5 = arith.constant 0 : index
    %7 = vector.load %arg4[%c0_4, %c0_5] : memref<8x128xf32, #tpu.memory_space<vmem>>, vector<8x128xf32>
    %8 = vector.shape_cast %6 : vector<48x128xf32> to vector<6x8x128xf32>
    %cst = arith.constant dense<0.000000e+00> : vector<8x128xf32>
    %9 = vector.multi_reduction <add>, %8, %cst [0] : vector<6x8x128xf32> to vector<8x128xf32>
    %10 = arith.addf %7, %9 : vector<8x128xf32>
    %c0_6 = arith.constant 0 : index
    %c0_7 = arith.constant 0 : index
    %11 = vector.load %arg4[%c0_6, %c0_7] : memref<8x128xf32, #tpu.memory_space<vmem>>, vector<8x128xf32>
    tpu.vector_store %arg4[%c0_6, %c0_7], %10 {strides = array<i32>} : memref<8x128xf32, #tpu.memory_space<vmem>>, vector<8x128xf32>,
    %c0_i32_8 = arith.constant 0 : i32
    %12 = arith.cmpi eq, %arg0, %c0_i32_8 : i32
    %13 = arith.extui %12 : i1 to i32
    %c0_i32_9 = arith.constant 0 : i32
    %14 = arith.cmpi ne, %13, %c0_i32_9 : i32
    scf.if %14 {
      %c0_10 = arith.constant 0 : index
      %c0_11 = arith.constant 0 : index
      %15 = vector.load %arg4[%c0_10, %c0_11] : memref<8x128xf32, #tpu.memory_space<vmem>>, vector<8x128xf32>
      %16 = vector.shape_cast %15 : vector<8x128xf32> to vector<1x8x128xf32>
      %cst_12 = arith.constant dense<0.000000e+00> : vector<1xf32>
      %17 = vector.multi_reduction <add>, %16, %cst_12 [1, 2] : vector<1x8x128xf32> to vector<1xf32>
      %18 = vector.shape_cast %17 : vector<1xf32> to vector<1x1x1xf32>
      %19 = vector.extract %18[0, 0, 0] : f32 from vector<1x1x1xf32>
      %20 = vector.broadcast %19 : f32 to vector<1x1xf32>
      %c0_13 = arith.constant 0 : index
      %c0_14 = arith.constant 0 : index
      %21 = vector.load %arg3[%c0_13, %c0_14] : memref<1x1xf32, #tpu.memory_space<vmem>>, vector<1x1xf32>
      tpu.vector_store %arg3[%c0_13, %c0_14], %20 {strides = array<i32>} : memref<1x1xf32, #tpu.memory_space<vmem>>, vector<1x1xf32>,
    } else {
    }
    return
  }
  func.func @transform_0(%arg0: i32) -> (i32, i32) {
    %c0_i32 = arith.constant 0 : i32
    %c0_i32_0 = arith.constant 0 : i32
    return %arg0, %c0_i32 : i32, i32
  }
  func.func @transform_1(%arg0: i32) -> (i32, i32) {
    %c0_i32 = arith.constant 0 : i32
    %c0_i32_0 = arith.constant 0 : i32
    return %arg0, %c0_i32 : i32, i32
  }
  func.func @transform_2(%arg0: i32) -> (i32, i32) {
    %c0_i32 = arith.constant 0 : i32
    %c0_i32_0 = arith.constant 0 : i32
    %c0_i32_1 = arith.constant 0 : i32
    return %c0_i32, %c0_i32_0 : i32, i32
  }
}

</mosaic_0001>

<bundles_post_ra>
// kernel: tpu_custom_call.1
= control target key start
LH: loop header
LB: loop body
LE: loop exit
PB: predicated region body
PF: predicated region fallthrough
CT: control target
= control target key end

     0   :  { %7 = vsyncpa [#allocation4], 0  ;;  %s244_s0 = inlined_call_operand.hbm [shape: f32[48,128], index: 0, kind: input, shape index: {}]   ;;  %s245_s1 = inlined_call_operand.hbm [shape: f32[48,128], index: 1, kind: input, shape index: {}]   ;;  %s246_s2 = inlined_call_operand.hbm [shape: f32[1,1], index: 2, kind: output, shape index: {}]  }
   0x1   :  { %8 = vsyncpa [#allocation7], 0 }
   0x2   :  { %9 = vsyncpa [#allocation5], 0  ;;  %s188_s9 = smov [#allocation3]   ;;  %s116_s13 = scalar_lea.hbm %s244_s0, 768 }
   0x3   :  { %s15_s10 = sshll.u32 %s188_s9, 4  ;;  %p117_p0 = scmp.ne.s32.totalorder %s244_s0, %s116_s13  ;;  %s16_s10 = int_to_ptr.vmem [resolvable:$true] %s15_s10 }
   0x4   :  { %p120_p1 = scmp.lt.u32.totalorder %s116_s13, %s244_s0 }
   0x6   :  { %p122_p2 = pnand %p120_p1, %p117_p0 }
   0x8   :  { %125 = shalt.err (!%p122_p2)
}
   0x9   :  { %s126_s18 = scalar_lea.vmem %s16_s10, 768  ;;  %p131_p4 = scmp.lt.s32.totalorder %s16_s10, %s16_s10 }
   0xa   :  { %p127_p3 = scmp.ne.s32.totalorder %s16_s10, %s126_s18  ;;  %p132_p5 = scmp.lt.s32.totalorder %s126_s18, %s126_s18 }
   0xc   :  { %p133_p6 = por %p132_p5, %p131_p4 }
   0xe   :  { %p134_p7 = pnand %p133_p6, %p127_p3 }
  0x10   :  { %137 = shalt.err (!%p134_p7)
}
  0x11   :  { %s189_s19 = smov 128   ;;  %s190_s20 = smov 8  }
  0x12   :  { %21 = dma.hbm_to_vmem [thread:$0]  %s244_s0, 768, %s16_s10, [#allocation4], %s189_s19, %s189_s19, %s190_s20  }
  0x13   :  { %s191_s23 = smov [#allocation6]   ;;  %s138_s27 = scalar_lea.hbm %s245_s1, 768 }
  0x14   :  { %s27_s24 = sshll.u32 %s191_s23, 4  ;;  %p139_p8 = scmp.ne.s32.totalorder %s245_s1, %s138_s27  ;;  %s28_s24 = int_to_ptr.vmem [resolvable:$true] %s27_s24 }
  0x15   :  { %p142_p9 = scmp.lt.u32.totalorder %s138_s27, %s245_s1 }
  0x17   :  { %p144_p10 = pnand %p142_p9, %p139_p8 }
  0x19   :  { %147 = shalt.err (!%p144_p10)
}
  0x1a   :  { %s148_s4 = scalar_lea.vmem %s28_s24, 768  ;;  %p153_p12 = scmp.lt.s32.totalorder %s28_s24, %s28_s24 }
  0x1b   :  { %p149_p11 = scmp.ne.s32.totalorder %s28_s24, %s148_s4  ;;  %p154_p13 = scmp.lt.s32.totalorder %s148_s4, %s148_s4 }
  0x1d   :  { %p155_p0 = por %p154_p13, %p153_p12 }
  0x1f   :  { %p156_p1 = pnand %p155_p0, %p149_p11 }
  0x21   :  { %159 = shalt.err (!%p156_p1)
}
  0x22   :  { %33 = dma.hbm_to_vmem [thread:$0]  %s245_s1, 768, %s28_s24, [#allocation7], %s189_s19, %s189_s19, %s190_s20  }
  0x23   :  { %182 = dma.done.wait [#allocation4], 768  }
  0x24   :  { %183 = vsyncadd [#allocation4], 4294966528 }
  0x25   :  { %184 = dma.done.wait [#allocation7], 768  }
  0x26   :  { %185 = vsyncadd [#allocation7], 4294966528  ;;  %v45_v0 = vld [vmem:[#allocation3] sm:$0xff]  ;;  %v46_v1 = vld [vmem:[#allocation3 + $0x8] sm:$0xff]  ;;  %s192_s1 = smov [#allocation8]   ;;  %vm91_vm0 = vcmask 0  }
  0x27   :  { %v47_v2 = vld [vmem:[#allocation3 + $0x10] sm:$0xff]  ;;  %v48_v3 = vld [vmem:[#allocation3 + $0x18] sm:$0xff]  ;;  %v49_v4 = vld [vmem:[#allocation3 + $0x20] sm:$0xff]  ;;  %s99_s6 = sshll.u32 %s192_s1, 4  ;;  %s100_s6 = int_to_ptr.vmem [resolvable:$true] %s99_s6 }
  0x28   :  { %v51_v5 = vld [vmem:[#allocation6] sm:$0xff]  ;;  %v52_v6 = vld [vmem:[#allocation6 + $0x8] sm:$0xff]  ;;  %v53_v7 = vld [vmem:[#allocation6 + $0x10] sm:$0xff]  ;;  %s160_s8 = scalar_lea.vmem %s100_s6, 16  ;;  %s164_s9 = scalar_lea.vmem %s100_s6, 32 }
  0x29   :  { %v54_v8 = vld [vmem:[#allocation6 + $0x18] sm:$0xff]  ;;  %v55_v9 = vld [vmem:[#allocation6 + $0x20] sm:$0xff]  ;;  %v57_v10 = vsub.f32 %v45_v0, %v51_v5  ;;  %v58_v11 = vsub.f32 %v46_v1, %v52_v6  ;;  %v59_v12 = vsub.f32 %v47_v2, %v53_v7  ;;  %v56_v14 = vld [vmem:[#allocation6 + $0x28] sm:$0xff]  ;;  %p161_p2 = scmp.ne.s32.totalorder %s100_s6, %s160_s8  ;;  %p165_p3 = scmp.lt.s32.totalorder %s100_s6, %s100_s6 }
  0x2a   :  { %v50_v13 = vld [vmem:[#allocation3 + $0x28] sm:$0xff]  ;;  %v60_v15 = vsub.f32 %v48_v3, %v54_v8  ;;  %v61_v16 = vsub.f32 %v49_v4, %v55_v9  ;;  %p166_p4 = scmp.lt.s32.totalorder %s164_s9, %s160_s8 }
  0x2b   :  { %v63_v17 = vand.u32 2147483647, %v57_v10  ;;  %v64_v18 = vand.u32 2147483647, %v58_v11  ;;  %v65_v19 = vand.u32 2147483647, %v59_v12  ;;  %v62_v20 = vsub.f32 %v50_v13, %v56_v14 }
  0x2c   :  { %v66_v21 = vand.u32 2147483647, %v60_v15  ;;  %v67_v23 = vand.u32 2147483647, %v61_v16  ;;  %p167_p5 = por %p166_p4, %p165_p3 }
  0x2d   :  { %v70_v22 = vadd.f32 %v64_v18, %v63_v17  ;;  %v68_v25 = vand.u32 2147483647, %v62_v20 }
  0x2e   :  { %p168_p6 = pnand %p167_p5, %p161_p2 }
  0x2f   :  { %v71_v24 = vadd.f32 %v70_v22, %v65_v19 }
  0x31   :  { %v72_v26 = vadd.f32 %v71_v24, %v66_v21 }
  0x33   :  { %v73_v27 = vadd.f32 %v72_v26, %v67_v23 }
  0x35   :  { %v74_v28 = vadd.f32 %v73_v27, %v68_v25 }
  0x37   :  { %81 = vadd.xlane.f32.xlu0 %v74_v28 }
  0xc4   :  { %v82_v29 = vpop.xlane.xlu0 %81 }
  0xc5   :  { %v83_v30 = vrot.slane %v82_v29, 4 }
  0xc7   :  { %v84_v31 = vadd.f32 %v83_v30, %v82_v29 }
  0xc9   :  { %v85_v32 = vrot.slane %v84_v31, 2 }
  0xcb   :  { %v86_v33 = vadd.f32 %v85_v32, %v84_v31 }
  0xcd   :  { %v87_v34 = vrot.slane %v86_v33, 1 }
  0xcf   :  { %v88_v35 = vadd.f32 %v87_v34, %v86_v33 }
  0xd1   :  { %109 = vpush %v88_v35 }
 0x102   :  { %s110_s7 = spop %109 }
 0x103   :  { %v90_v36 = vstv %s110_s7 }
 0x104   :  { %92 = vst.msk [vmem:[#allocation8] sm:$0x1] %vm91_vm0, %v90_v36 }
 0x105   :  { %171 = shalt.err (!%p168_p6)
}
 0x106   :  { %s172_s12 = scalar_lea.hbm %s246_s2, 16 }
 0x107   :  { %p173_p7 = scmp.ne.s32.totalorder %s246_s2, %s172_s12  ;;  %p176_p8 = scmp.lt.u32.totalorder %s172_s12, %s246_s2 }
 0x109   :  { %p178_p9 = pnand %p176_p8, %p173_p7 }
 0x10b   :  { %181 = shalt.err (!%p178_p9)
}
 0x10c   :  { %102 = dma.vmem_to_hbm [thread:$0]  %s100_s6, 16, %s246_s2, [#allocation5]  }
 0x10d   :  { %186 = dma.done.wait [#allocation5], 16  }
 0x10e   :  { %187 = vsyncadd [#allocation5], 4294967280 }
 0x10f   :  { %106 = vsyncpa [#allocation4], 1 }
 0x110   :  { %107 = vsyncpa [#allocation7], 1 }
 0x111   :  { %108 = vsyncpa [#allocation5], 1 }

</bundles_post_ra>
